<compile_context>
chip_gen: v7x
topology: tpu7x:2x2x1
jax: 0.10.0
libtpu: 0.0.40
codegen_flags: <defaults>
</compile_context>

<pallas_src>
import jax
import jax.numpy as jnp
from jax import lax
from jax.experimental import pallas as pl
from jax.experimental.pallas import tpu as pltpu


def _round_up(x, m):
    return ((x + m - 1) // m) * m


def _vmem_gather_kernel(ids_ref, table_ref, out_ref):
    """Gather rows of a VMEM-resident table into one output tile.

    ids_ref   : (N_pad,) int32 token ids in SMEM (scalar prefetch)
    table_ref : (V, E) embedding table, resident in VMEM (constant block)
    out_ref   : (TN, E) output block in VMEM (auto-pipelined)
    """
    tn = out_ref.shape[0]
    base = pl.program_id(0) * tn

    def body(t, carry):
        tok = ids_ref[base + t]
        # Exact on-chip row copy: 1 dynamic vld + 1 dynamic vst per token,
        # zero HBM traffic beyond the one-time table load.
        out_ref[pl.ds(t, 1), :] = table_ref[pl.ds(tok, 1), :]
        return carry

    lax.fori_loop(0, tn, body, 0, unroll=min(8, tn))


def _hbm_gather_kernel(ids_ref, table_hbm, out_ref, copy_sem):
    """Row-gather straight from HBM for tables too large to keep in VMEM.

    ids_ref   : (N_pad,) int32 token ids in SMEM (scalar prefetch)
    table_hbm : (V, E) embedding table left in HBM (pl.ANY)
    out_ref   : (TN, E) output block in VMEM (auto-pipelined)
    copy_sem  : DMA semaphore shared by all (identically sized) row copies
    """
    tn = out_ref.shape[0]
    base = pl.program_id(0) * tn
    window = min(16, tn)  # bounded number of outstanding row DMAs

    def start_copy(t):
        tok = ids_ref[base + t]
        pltpu.make_async_copy(
            table_hbm.at[pl.ds(tok, 1), :],   # (1, E) row in HBM
            out_ref.at[pl.ds(t, 1), :],       # (1, E) row of the output block
            copy_sem,
        ).start()

    def _prime(t, carry):
        start_copy(t)
        return carry

    lax.fori_loop(0, window, _prime, 0, unroll=True)

    # All copies have identical size and share one semaphore, so a single
    # fixed descriptor (constructed once, outside the loop) is enough to wait:
    # no per-token SMEM id re-reads on the scalar slot.
    wait_desc = pltpu.make_async_copy(
        table_hbm.at[pl.ds(0, 1), :], out_ref.at[pl.ds(0, 1), :], copy_sem)

    def _drain(t, carry):
        wait_desc.wait()

        @pl.when(t + window < tn)
        def _():
            start_copy(t + window)

        return carry

    lax.fori_loop(0, tn, _drain, 0, unroll=min(8, tn))


def bow_encoder(sequences, sequence_lengths, embedding_table, *,
                tokens_per_step=1024,
                vmem_table_budget_bytes=16 * 1024 * 1024,
                force_hbm_gather=False):
    """Equivalent of BOWEncoder.forward(sequences, sequence_lengths)."""
    del sequence_lengths  # unused by the reference forward pass
    b, s = sequences.shape
    v, e = embedding_table.shape
    n = b * s

    itemsize = jnp.dtype(embedding_table.dtype).itemsize
    e_pad = _round_up(e, 128)            # lane-padded row footprint in VMEM
    v_pad = _round_up(v, 8)
    table_vmem_bytes = v_pad * e_pad * itemsize

    ids = sequences.reshape(n).astype(jnp.int32)
    ids = jnp.clip(ids, 0, v - 1)        # keep gathers in-bounds (see TODO above)

    # Tokens per grid step: multiple of 8 (sublane), large enough to amortize
    # the ~0.35us/step grid overhead, small enough that the double-buffered
    # output block stays comfortably inside scoped VMEM.
    tn_vmem_cap = max(8, ((12 << 20) // (2 * e_pad * itemsize)) // 8 * 8)
    tn = min(tokens_per_step, tn_vmem_cap, _round_up(n, 8))
    # v7x megacore: keep at least 2 grid steps when there are enough tokens.
    if n > 8 and pl.cdiv(n, tn) < 2:
        tn = max(8, _round_up(pl.cdiv(n, 2), 8))
    grid = (pl.cdiv(n, tn),)

    # Pad ids so SMEM scalar reads in the (masked) boundary block stay in
    # range; the output itself is NOT padded (no post-kernel slice copy).
    n_pad = grid[0] * tn
    if n_pad != n:
        ids = jnp.pad(ids, (0, n_pad - n))
    # TODO(synk): for very large b*s, feed ids as a blocked SMEM input instead
    # of scalar-prefetching the whole array (SMEM capacity limit).

    out_block_vmem_bytes = tn * e_pad * itemsize
    out_shape = jax.ShapeDtypeStruct((n, e), embedding_table.dtype)
    out_spec = pl.BlockSpec((tn, e), lambda i, ids_sref: (i, 0))
    # TODO(synk): for E << 128 a lane-dense packed output layout (128/E tokens
    # per 128-lane row) would make stores/writeback denser, but changes the
    # layout handed back to the caller, so we keep the logical (N, E) layout.

    use_resident = (not force_hbm_gather) and (
        table_vmem_bytes <= vmem_table_budget_bytes)

    if use_resident:
        vmem_limit = int(min(
            64 << 20,
            max(32 << 20,
                2 * table_vmem_bytes + 4 * out_block_vmem_bytes + (4 << 20))))
        out_flat = pl.pallas_call(
            _vmem_gather_kernel,
            out_shape=out_shape,
            grid_spec=pltpu.PrefetchScalarGridSpec(
                num_scalar_prefetch=1,                    # ids -> SMEM
                grid=grid,
                in_specs=[
                    # Whole table as one constant-index block: DMA'd into
                    # VMEM once, then reused by every grid step.
                    pl.BlockSpec((v, e), lambda i, ids_sref: (0, 0)),
                ],
                out_specs=out_spec,
            ),
            compiler_params=pltpu.CompilerParams(
                dimension_semantics=("parallel",),        # shard tokens across TCs
                vmem_limit_bytes=vmem_limit,
            ),
        )(ids, embedding_table)
    else:
        vmem_limit = int(min(
            64 << 20,
            max(32 << 20, 4 * out_block_vmem_bytes + (4 << 20))))
        out_flat = pl.pallas_call(
            _hbm_gather_kernel,
            out_shape=out_shape,
            grid_spec=pltpu.PrefetchScalarGridSpec(
                num_scalar_prefetch=1,                    # ids -> SMEM
                grid=grid,
                in_specs=[
                    pl.BlockSpec(memory_space=pl.ANY),    # table stays in HBM
                ],
                out_specs=out_spec,
                scratch_shapes=[pltpu.SemaphoreType.DMA(())],
            ),
            compiler_params=pltpu.CompilerParams(
                dimension_semantics=("parallel",),
                vmem_limit_bytes=vmem_limit,
            ),
        )(ids, embedding_table)

    return out_flat.reshape(b, s, e)


if __name__ == "__main__":
    key = jax.random.PRNGKey(0)
    k_ids, k_emb = jax.random.split(key)

    batch, seq_len = 2, 8
    vocab_size, embed_dim = 64, 32

    # Deterministic synthetic parameters for nn.Embedding(vocab_size, embed_dim).
    embedding_table = jax.random.normal(
        k_emb, (vocab_size, embed_dim), dtype=jnp.float32
    )
    sequences = jax.random.randint(
        k_ids, (batch, seq_len), 0, vocab_size, dtype=jnp.int32
    )
    sequence_lengths = jnp.full((batch,), seq_len, dtype=jnp.int32)

    # Pure-JAX reference of `self.embeddings(sequences)`.
    ref = embedding_table[sequences]

    # Primary (VMEM-resident table) path.
    out = jax.block_until_ready(
        bow_encoder(sequences, sequence_lengths, embedding_table)
    )
    assert out.shape == (batch, seq_len, embed_dim), out.shape
    assert out.dtype == ref.dtype, (out.dtype, ref.dtype)
    assert jnp.array_equal(out, ref), "VMEM-resident gather mismatch"

    # Fallback (HBM row-DMA) path, exercised explicitly for coverage.
    out_hbm = jax.block_until_ready(
        bow_encoder(sequences, sequence_lengths, embedding_table,
                    force_hbm_gather=True)
    )
    assert jnp.array_equal(out_hbm, ref), "HBM DMA gather mismatch"

    print("KERNEL_OK")
</pallas_src>

<mosaic_0001>
module attributes {stable_mosaic.version = 11 : i64} {
  func.func @_vmem_gather_kernel(%arg0: i32, %arg1: memref<16xi32, #tpu.memory_space<smem>>, %arg2: memref<64x32xf32, #tpu.memory_space<vmem>>, %arg3: memref<8x32xf32, #tpu.memory_space<vmem>>) attributes {dimension_semantics = [#tpu.dimension_semantics<parallel>], iteration_bounds = array<i64: 2>, scalar_prefetch = 1 : i64, scratch_operands = 0 : i64, tpu.core_type = #tpu.core_type<tc>, window_params = [{pipeline_mode = #tpu.pipeline_mode<synchronous>, transform_indices = @transform_0, window_bounds = array<i64: 64, 32>}, {transform_indices = @transform_1, window_bounds = array<i64: 8, 32>}]} {
    %c8_i32 = arith.constant 8 : i32
    %0 = arith.muli %arg0, %c8_i32 : i32
    %c0_i32 = arith.constant 0 : i32
    %1 = arith.addi %0, %c0_i32 : i32
    %2 = arith.index_cast %1 : i32 to index
    %3 = memref.load %arg1[%2] : memref<16xi32, #tpu.memory_space<smem>>
    %4 = arith.index_cast %3 : i32 to index
    %c0 = arith.constant 0 : index
    %5 = vector.load %arg2[%4, %c0] : memref<64x32xf32, #tpu.memory_space<vmem>>, vector<1x32xf32>
    %6 = arith.index_cast %c0_i32 : i32 to index
    %c0_0 = arith.constant 0 : index
    %7 = vector.load %arg3[%6, %c0_0] : memref<8x32xf32, #tpu.memory_space<vmem>>, vector<1x32xf32>
    tpu.vector_store %arg3[%6, %c0_0], %5 {strides = array<i32>} : memref<8x32xf32, #tpu.memory_space<vmem>>, vector<1x32xf32>,
    %c1_i32 = arith.constant 1 : i32
    %8 = arith.addi %0, %c1_i32 : i32
    %9 = arith.index_cast %8 : i32 to index
    %10 = memref.load %arg1[%9] : memref<16xi32, #tpu.memory_space<smem>>
    %11 = arith.index_cast %10 : i32 to index
    %c0_1 = arith.constant 0 : index
    %12 = vector.load %arg2[%11, %c0_1] : memref<64x32xf32, #tpu.memory_space<vmem>>, vector<1x32xf32>
    %13 = arith.index_cast %c1_i32 : i32 to index
    %c0_2 = arith.constant 0 : index
    %14 = vector.load %arg3[%13, %c0_2] : memref<8x32xf32, #tpu.memory_space<vmem>>, vector<1x32xf32>
    tpu.vector_store %arg3[%13, %c0_2], %12 {strides = array<i32>} : memref<8x32xf32, #tpu.memory_space<vmem>>, vector<1x32xf32>,
    %c2_i32 = arith.constant 2 : i32
    %15 = arith.addi %0, %c2_i32 : i32
    %16 = arith.index_cast %15 : i32 to index
    %17 = memref.load %arg1[%16] : memref<16xi32, #tpu.memory_space<smem>>
    %18 = arith.index_cast %17 : i32 to index
    %c0_3 = arith.constant 0 : index
    %19 = vector.load %arg2[%18, %c0_3] : memref<64x32xf32, #tpu.memory_space<vmem>>, vector<1x32xf32>
    %20 = arith.index_cast %c2_i32 : i32 to index
    %c0_4 = arith.constant 0 : index
    %21 = vector.load %arg3[%20, %c0_4] : memref<8x32xf32, #tpu.memory_space<vmem>>, vector<1x32xf32>
    tpu.vector_store %arg3[%20, %c0_4], %19 {strides = array<i32>} : memref<8x32xf32, #tpu.memory_space<vmem>>, vector<1x32xf32>,
    %c3_i32 = arith.constant 3 : i32
    %22 = arith.addi %0, %c3_i32 : i32
    %23 = arith.index_cast %22 : i32 to index
    %24 = memref.load %arg1[%23] : memref<16xi32, #tpu.memory_space<smem>>
    %25 = arith.index_cast %24 : i32 to index
    %c0_5 = arith.constant 0 : index
    %26 = vector.load %arg2[%25, %c0_5] : memref<64x32xf32, #tpu.memory_space<vmem>>, vector<1x32xf32>
    %27 = arith.index_cast %c3_i32 : i32 to index
    %c0_6 = arith.constant 0 : index
    %28 = vector.load %arg3[%27, %c0_6] : memref<8x32xf32, #tpu.memory_space<vmem>>, vector<1x32xf32>
    tpu.vector_store %arg3[%27, %c0_6], %26 {strides = array<i32>} : memref<8x32xf32, #tpu.memory_space<vmem>>, vector<1x32xf32>,
    %c4_i32 = arith.constant 4 : i32
    %29 = arith.addi %0, %c4_i32 : i32
    %30 = arith.index_cast %29 : i32 to index
    %31 = memref.load %arg1[%30] : memref<16xi32, #tpu.memory_space<smem>>
    %32 = arith.index_cast %31 : i32 to index
    %c0_7 = arith.constant 0 : index
    %33 = vector.load %arg2[%32, %c0_7] : memref<64x32xf32, #tpu.memory_space<vmem>>, vector<1x32xf32>
    %34 = arith.index_cast %c4_i32 : i32 to index
    %c0_8 = arith.constant 0 : index
    %35 = vector.load %arg3[%34, %c0_8] : memref<8x32xf32, #tpu.memory_space<vmem>>, vector<1x32xf32>
    tpu.vector_store %arg3[%34, %c0_8], %33 {strides = array<i32>} : memref<8x32xf32, #tpu.memory_space<vmem>>, vector<1x32xf32>,
    %c5_i32 = arith.constant 5 : i32
    %36 = arith.addi %0, %c5_i32 : i32
    %37 = arith.index_cast %36 : i32 to index
    %38 = memref.load %arg1[%37] : memref<16xi32, #tpu.memory_space<smem>>
    %39 = arith.index_cast %38 : i32 to index
    %c0_9 = arith.constant 0 : index
    %40 = vector.load %arg2[%39, %c0_9] : memref<64x32xf32, #tpu.memory_space<vmem>>, vector<1x32xf32>
    %41 = arith.index_cast %c5_i32 : i32 to index
    %c0_10 = arith.constant 0 : index
    %42 = vector.load %arg3[%41, %c0_10] : memref<8x32xf32, #tpu.memory_space<vmem>>, vector<1x32xf32>
    tpu.vector_store %arg3[%41, %c0_10], %40 {strides = array<i32>} : memref<8x32xf32, #tpu.memory_space<vmem>>, vector<1x32xf32>,
    %c6_i32 = arith.constant 6 : i32
    %43 = arith.addi %0, %c6_i32 : i32
    %44 = arith.index_cast %43 : i32 to index
    %45 = memref.load %arg1[%44] : memref<16xi32, #tpu.memory_space<smem>>
    %46 = arith.index_cast %45 : i32 to index
    %c0_11 = arith.constant 0 : index
    %47 = vector.load %arg2[%46, %c0_11] : memref<64x32xf32, #tpu.memory_space<vmem>>, vector<1x32xf32>
    %48 = arith.index_cast %c6_i32 : i32 to index
    %c0_12 = arith.constant 0 : index
    %49 = vector.load %arg3[%48, %c0_12] : memref<8x32xf32, #tpu.memory_space<vmem>>, vector<1x32xf32>
    tpu.vector_store %arg3[%48, %c0_12], %47 {strides = array<i32>} : memref<8x32xf32, #tpu.memory_space<vmem>>, vector<1x32xf32>,
    %c7_i32 = arith.constant 7 : i32
    %50 = arith.addi %0, %c7_i32 : i32
    %51 = arith.index_cast %50 : i32 to index
    %52 = memref.load %arg1[%51] : memref<16xi32, #tpu.memory_space<smem>>
    %53 = arith.index_cast %52 : i32 to index
    %c0_13 = arith.constant 0 : index
    %54 = vector.load %arg2[%53, %c0_13] : memref<64x32xf32, #tpu.memory_space<vmem>>, vector<1x32xf32>
    %55 = arith.index_cast %c7_i32 : i32 to index
    %c0_14 = arith.constant 0 : index
    %56 = vector.load %arg3[%55, %c0_14] : memref<8x32xf32, #tpu.memory_space<vmem>>, vector<1x32xf32>
    tpu.vector_store %arg3[%55, %c0_14], %54 {strides = array<i32>} : memref<8x32xf32, #tpu.memory_space<vmem>>, vector<1x32xf32>,
    %c8_i32_15 = arith.constant 8 : i32
    return
  }
  func.func @transform_0(%arg0: i32, %arg1: memref<16xi32, #tpu.memory_space<smem>>) -> (i32, i32) {
    %c0_i32 = arith.constant 0 : i32
    %c0_i32_0 = arith.constant 0 : i32
    %c0_i32_1 = arith.constant 0 : i32
    return %c0_i32, %c0_i32_0 : i32, i32
  }
  func.func @transform_1(%arg0: i32, %arg1: memref<16xi32, #tpu.memory_space<smem>>) -> (i32, i32) {
    %c0_i32 = arith.constant 0 : i32
    %c0_i32_0 = arith.constant 0 : i32
    return %arg0, %c0_i32 : i32, i32
  }
}

</mosaic_0001>

<bundles_post_ra>
// kernel: tpu_custom_call.1
= control target key start
LH: loop header
LB: loop body
LE: loop exit
PB: predicated region body
PF: predicated region fallthrough
CT: control target
= control target key end

     0   :  { %s491_s0 = inlined_call_operand.vmem [shape: s32[16], index: 0, kind: input, shape index: {}]   ;;  %s492_s1 = inlined_call_operand.vmem [shape: f32[64,32], index: 1, kind: input, shape index: {}]   ;;  %s493_s2 = inlined_call_operand.hbm [shape: f32[16,32], index: 2, kind: output, shape index: {}]  }
   0x1   :  { %s7_s11 = sshll.u32 %s491_s0, 4  ;;  %s8_s11 = int_to_ptr.vmem [resolvable:$true] %s7_s11 }
   0x2   :  { %s261_s12 = scalar_lea.vmem %s8_s11, 16  ;;  %p266_p1 = scmp.lt.s32.totalorder %s8_s11, %s8_s11 }
   0x3   :  { %p262_p0 = scmp.ne.s32.totalorder %s8_s11, %s261_s12  ;;  %p267_p2 = scmp.lt.s32.totalorder %s261_s12, %s261_s12 }
   0x5   :  { %p268_p3 = por %p267_p2, %p266_p1 }
   0x7   :  { %p269_p4 = pnand %p268_p3, %p262_p0 }
   0x9   :  { %272 = shalt.err (!%p269_p4)  }
   0xa   :  { %s339_s13 = smov [#allocation3]  }
   0xb   :  { %10 = dma.vmem_to_smem %s8_s11, 16, %s339_s13, [#allocation2] }
   0xc   :  { %317 = dma.done.wait [#allocation2], 16 }
   0xd   :  { %318 = vsyncadd [#allocation2], 4294967280 }
   0xe   :  { %12 = sfence }
   0xf   :  { %13 = vsyncpa [#allocation5], 0 }
  0x10   :  { %15 = vsyncpa [#allocation5 + $0x1], 0  ;;  %s359_s14 = smov 0   ;;  %s361_s15 = smov 0  }
  0x11   :  { %s363_s0 = smov 0   ;;  %s365_s16 = smov 0  }
  0x12 LB: > { %496 = sst [smem:[#allocation8_spill]] %s333_s0  ;;  %s380_s17 = sadd.s32 4294967295, %s337_s16   ;;  %s337_s16 = sphi %s365_s16, %s505_s16   ;;  %s333_s0 = sphi %s363_s0, %s502_s0   ;;  %s329_s15 = sphi %s361_s15, %s504_s15   ;;  %s325_s14 = sphi %s359_s14, %s503_s14  }
  0x13   : > { %s212_s18 = sadd.s32 4294967294, %s337_s16   ;;  %s384_s19 = sadd.s32 1, %s337_s16  }
  0x14   : > { %s49_s20 = sadd.s32 1, %s333_s0  ;;  %s46_s21 = ssub.s32 %s337_s16, %s384_s19 }
  0x15   : > { %p59_p5 = scmp.ne.s32.totalorder %s333_s0, %s329_s15  ;;  %p47_p6 = scmp.eq.s32.totalorder %s46_s21, 0 }
  0x16   : > { %p60_p7 = scmp.eq.s32.totalorder %s380_s17, 1  ;;  %p65_p8 = scmp.ne.s32.totalorder %s329_s15, %s325_s14 }
  0x17   : > { %p66_p9 = scmp.eq.s32.totalorder %s212_s18, 1  ;;  %p214_p12 = scmp.ge.s32.totalorder %s337_s16, 1 }
  0x18   : > { %s395_s22 = scalar_select %p47_p6, %s333_s0, %s49_s20  }
  0x19   : > { %p397_p10 = por %p60_p7, %p59_p5  ;;  %p401_p11 = por %p66_p9, %p65_p8 }
  0x1a   : > { %497 = sst [smem:[#allocation9_spill]] %s395_s22  ;;  %p87_p13 = scmp.lt.s32.totalorder %s337_s16, 3 }
  0x1c   : > { %p88_p0 = pnand %p214_p12, %p87_p13 }
  0x1d   : > { %s494_s25 = sand.u32 (!%p88_p0), 1, %s329_s15   ;;  %s216_s26 = sshll.u32 (!%p88_p0), %s380_s17, 3  ;;  %vm106_vm0 = vcmask (!%p88_p0), 253952  }
  0x1e   : > { %91 = sbr.rel (%p88_p0) target bundleno = 68 (0x44), region = 24  ;;  %s215_s27 = sshll.u32 (!%p88_p0), %s494_s25, 3 }
  0x1f   : > { %s103_s28 = sld [smem:[#allocation3 + %s216_s26]] (!%p88_p0)  ;;  %s108_s29 = sadd.s32 (!%p88_p0), 1, %s216_s26 }
  0x20   : > { %s113_s30 = sadd.s32 (!%p88_p0), 2, %s216_s26  ;;  %s109_s3 = sld [smem:[#allocation3 + %s108_s29]] (!%p88_p0) }
  0x21   : > { %s114_s4 = sld [smem:[#allocation3 + %s113_s30]] (!%p88_p0)  ;;  %s118_s5 = sadd.s32 (!%p88_p0), 3, %s216_s26 }
  0x22   : > { %s123_s6 = sadd.s32 (!%p88_p0), 4, %s216_s26  ;;  %s119_s7 = sld [smem:[#allocation3 + %s118_s5]] (!%p88_p0) }
  0x23   : > { %s124_s8 = sld [smem:[#allocation3 + %s123_s6]] (!%p88_p0)  ;;  %s128_s12 = sadd.s32 (!%p88_p0), 5, %s216_s26 }
  0x24   : > { %s129_s13 = sld [smem:[#allocation3 + %s128_s12]] (!%p88_p0)  ;;  %s133_s18 = sadd.s32 (!%p88_p0), 6, %s216_s26 }
  0x25   : > { %s104_s11 = scalar_lea.vmem %s492_s1, %s103_s28  ;;  %s101_s20 = scalar_lea.vmem [#allocation4], %s215_s27 }
  0x26   : > { %v105_v0 = vld [vmem:[%s104_s11] sm:$0x1]  ;;  %s134_s21 = sld [smem:[#allocation3 + %s133_s18]]  ;;  %s138_s29 = sadd.s32 7, %s216_s26 }
  0x27   : > { %107 = vst.msk [vmem:[%s101_s20] sm:$0x1] %vm106_vm0, %v105_v0  ;;  %s110_s22 = scalar_lea.vmem %s492_s1, %s109_s3  ;;  %s115_s0 = scalar_lea.vmem %s492_s1, %s114_s4 }
  0x28   : > { %v111_v1 = vld [vmem:[%s110_s22] sm:$0x1]  ;;  %s139_s28 = sld [smem:[#allocation3 + %s138_s29]]  ;;  %s120_s10 = scalar_lea.vmem %s492_s1, %s119_s7 }
  0x29   : > { %v116_v2 = vld [vmem:[%s115_s0] sm:$0x1]  ;;  %112 = vst.msk [vmem:[%s101_s20 + $0x1] sm:$0x1] %vm106_vm0, %v111_v1  ;;  %s125_s25 = scalar_lea.vmem %s492_s1, %s124_s8  ;;  %s218_s3 = sshll.u32 %s380_s17, 7 }
  0x2a   : > { %117 = vst.msk [vmem:[%s101_s20 + $0x2] sm:$0x1] %vm106_vm0, %v116_v2  ;;  %v121_v3 = vld [vmem:[%s120_s10] sm:$0x1]  ;;  %s130_s4 = scalar_lea.vmem %s492_s1, %s129_s13  ;;  %s157_s12 = sshll.u32 %s101_s20, 4  ;;  %s448_s12 = int_to_ptr.vmem [resolvable:$true] %s157_s12 }
  0x2b   : > { %v126_v4 = vld [vmem:[%s125_s25] sm:$0x1]  ;;  %122 = vst.msk [vmem:[%s101_s20 + $0x3] sm:$0x1] %vm106_vm0, %v121_v3  ;;  %s442_s30 = scalar_lea.hbm %s493_s2, %s218_s3  ;;  %s273_s9 = scalar_lea.vmem %s448_s12, 128 }
  0x2c   : > { %127 = vst.msk [vmem:[%s101_s20 + $0x4] sm:$0x1] %vm106_vm0, %v126_v4  ;;  %v131_v5 = vld [vmem:[%s130_s4] sm:$0x1]  ;;  %s135_s29 = scalar_lea.vmem %s492_s1, %s134_s21  ;;  %s500_s21 = sand.u32 1, %s329_s15  }
  0x2d   : > { %132 = vst.msk [vmem:[%s101_s20 + $0x5] sm:$0x1] %vm106_vm0, %v131_v5  ;;  %v136_v6 = vld [vmem:[%s135_s29] sm:$0x1]  ;;  %s144_s27 = scalar_lea.sflag [#allocation5], %s500_s21  ;;  %p274_p1 = scmp.ne.s32.totalorder %s448_s12, %s273_s9 }
  0x2e   : > { %137 = vst.msk [vmem:[%s101_s20 + $0x6] sm:$0x1] %vm106_vm0, %v136_v6  ;;  %s140_s13 = scalar_lea.vmem %s492_s1, %s139_s28  ;;  %s340_s10 = smov [#allocation4]  }
  0x2f   : > { %v141_v7 = vld [vmem:[%s140_s13] sm:$0x1]  ;;  %p275_p2 = pnand %p274_p1, %p397_p10  ;;  %s277_s26 = sshll.u32 %s340_s10, 4  ;;  %s278_s26 = int_to_ptr.vmem [resolvable:$false] %s277_s26 }
  0x30   : > { %142 = vst.msk [vmem:[%s101_s20 + $0x7] sm:$0x1] %vm106_vm0, %v141_v7  ;;  %s279_s11 = scalar_lea.vmem %s278_s26, 256  ;;  %p280_p4 = scmp.lt.s32.totalorder %s448_s12, %s278_s26 }
  0x31   : > { %p276_p3 = pneg %p275_p2  ;;  %p281_p5 = scmp.lt.s32.totalorder %s279_s11, %s273_s9 }
  0x33   : > { %p282_p6 = por %p281_p5, %p280_p4 }
  0x35   : > { %p283_p7 = pnand %p282_p6, %p276_p3 }
  0x37   : > { %286 = shalt.err (!%p283_p7)
}
  0x38   : > { %s287_s20 = scalar_lea.hbm %s442_s30, 128  ;;  %s291_s3 = scalar_lea.hbm %s493_s2, 256 }
  0x39   : > { %p288_p8 = scmp.ne.s32.totalorder %s442_s30, %s287_s20  ;;  %p292_p13 = scmp.lt.u32.totalorder %s442_s30, %s493_s2 }
  0x3a   : > { %p293_p0 = scmp.lt.u32.totalorder %s291_s3, %s287_s20  ;;  %p295_p2 = scmp.lt.u32.totalorder %s287_s20, %s442_s30 }
  0x3b   : > { %p289_p9 = pnand %p288_p8, %p397_p10 }
  0x3c   : > { %p294_p1 = por %p293_p0, %p292_p13 }
  0x3d   : > { %p290_p12 = pneg %p289_p9 }
  0x3e   : > { %p296_p3 = por %p295_p2, %p294_p1 }
  0x40   : > { %p297_p4 = pnand %p296_p3, %p290_p12 }
  0x42   : > { %300 = shalt.err (!%p297_p4)
}
  0x43   : > { %221 = dma.vmem_to_hbm [thread:$0]  (%p397_p10), %s448_s12, 128, %s442_s30, %s144_s27  }
  0x44 PF: > { %p227_p5 = scmp.ge.s32.totalorder %s337_s16, 2  ;;  %s169_s4 = sand.u32 1, %s325_s14  }
  0x45   : > { %s170_s7 = scalar_lea.sflag [#allocation5], %s169_s4 }
  0x46   : > { %p224_p6 = pnand %p227_p5, %p401_p11 }
  0x48   : > { %320 = dma.done.wait (!%p224_p6), %s170_s7, 128  }
  0x49   : > { %322 = vsyncadd (!%p224_p6), %s170_s7, 4294967168  ;;  %s501_s18 = sld [smem:[#allocation8_spill]]  ;;  %s502_s0 = sld [smem:[#allocation9_spill]] }
  0x4a   : > { %p18_p7 = scmp.ge.s32.totalorder %s384_s19, 4   ;;  %s503_s14 = smov %s329_s15 }
  0x4b   : > { %s505_s16 = smov %s384_s19 }
  0x4c   :  { %20 = sbr.rel (!%p18_p7) target bundleno = 18 (0x12), region = 64 }
  0x4f   : > { %s504_s15 = smov %s501_s18 }
  0x53   :  { %175 = vsyncpa [#allocation5], 1 }
  0x54   :  { %177 = vsyncpa [#allocation5 + $0x1], 1 }

</bundles_post_ra>
